<compile_context>
chip_gen: v6e
topology: v6e:2x2x1
jax: 0.10.0
libtpu: 0.0.40
codegen_flags: <defaults>
</compile_context>

<pallas_src>
import functools
import math

import jax
import jax.numpy as jnp
from jax.experimental import pallas as pl
from jax.experimental.pallas import tpu as pltpu

_LANES = 128
_SUBLANES = 8
_LN2 = math.log(2.0)


def _bce_ls_kernel(x_ref, t_ref, o_ref, *, smoothing, inner_steps, total_tiles,
                   valid_rows_last, sub, has_overrun):
    """One (tile_rows, lanes) block of stable BCE-with-logits + label smoothing.

    o_ref is this split's (sub, lanes) f32 accumulator (an output block that
    stays resident across the inner "arbitrary" grid axis).  The cross-lane
    reduce and the 1/N scale are hoisted to the wrapper.
    """
    outer = pl.program_id(0)
    inner = pl.program_id(1)

    # Zero this split's accumulator at the start of its reduction.
    @pl.when(inner == 0)
    def _():
        o_ref[...] = jnp.zeros_like(o_ref)

    x = x_ref[...].astype(jnp.float32)
    t = t_ref[...].astype(jnp.float32)

    # Label smoothing (constants folded at trace time).
    t = t * (1.0 - smoothing) + (0.5 * smoothing)

    # Numerically stable BCE-with-logits (matches torch.nn.BCEWithLogitsLoss):
    #   max(x, 0) - x*t + log1p(exp(-|x|))
    per_elem = jnp.maximum(x, 0.0) - x * t + jnp.log1p(jnp.exp(-jnp.abs(x)))

    tile_rows, lanes = per_elem.shape  # static

    def accumulate(vals):
        # Fold sublane groups into the (sub, lanes) accumulator: pure VPU vreg
        # adds, no cross-lane (XLU) work in the hot loop.
        o_ref[...] += jnp.sum(vals.reshape(tile_rows // sub, sub, lanes), axis=0)

    ragged = valid_rows_last < tile_rows  # static Python bool

    if not ragged and not has_overrun:
        # Common fast path: every tile is fully valid -> no masking at all.
        accumulate(per_elem)
    else:
        g = outer * inner_steps + inner          # global tile index (small int)
        last = total_tiles - 1
        plain_cond = (g < last) if ragged else (g <= last)

        @pl.when(plain_cond)
        def _():
            accumulate(per_elem)

        if ragged:
            # Only the single globally-last (partial) tile pays for the mask.
            @pl.when(g == last)
            def _():
                row = jax.lax.broadcasted_iota(jnp.int32, (tile_rows, lanes), 0)
                accumulate(jnp.where(row < valid_rows_last, per_elem, 0.0))
        # g > last (overrun step re-reading the clamped last tile): skip.


def _default_num_splits():
    """2 splits where the chip has 2 TensorCores; 1 elsewhere (v5e/v6e)."""
    try:
        kind = jax.devices()[0].device_kind.lower()
    except Exception:
        return 1
    if any(tag in kind for tag in ("v4", "v5p", "v7")):
        return 2
    return 1


def bce_with_logits_label_smoothing(inputs, targets, smoothing=0.1, *,
                                    tile_rows=None, num_splits=None):
    """inputs, targets: same-shape arrays (any rank/dtype). Returns f32 scalar."""
    assert inputs.shape == targets.shape
    n_elems = int(math.prod(inputs.shape))
    if n_elems == 0:
        return jnp.float32(jnp.nan)

    x_item = jnp.dtype(inputs.dtype).itemsize
    t_item = jnp.dtype(targets.dtype).itemsize
    max_item = max(x_item, t_item)

    # ---- Layout: lane-dense when possible, never a full-array pad copy. ----
    pad_elems = 0
    if n_elems % _LANES == 0:
        lanes = _LANES
    else:
        lanes = int(inputs.shape[-1]) if inputs.ndim >= 1 else 1
        # Pathological lane widths only: huge rows would blow VMEM, tiny rows
        # waste most of every vreg.  Fall back to a zero-padded lane-dense
        # layout; each zero-padded element contributes exactly log(2), which
        # is subtracted analytically below (no in-kernel masking needed).
        if lanes * max_item > (4 << 20) or lanes < 16:
            pad_elems = (-n_elems) % _LANES
            lanes = _LANES

    if pad_elems:
        x2 = jnp.pad(inputs.reshape(-1), (0, pad_elems)).reshape(-1, _LANES)
        t2 = jnp.pad(targets.reshape(-1), (0, pad_elems)).reshape(-1, _LANES)
    else:
        x2 = inputs.reshape(-1, lanes)   # free metadata reshape, no copy
        t2 = targets.reshape(-1, lanes)

    rows = x2.shape[0]

    # ---- Tile size: ~1 MiB per input block, dtype-scaled, multiple of 8. ----
    if tile_rows is None:
        tile_rows = (1 << 20) // (lanes * max_item)
    tile_rows = max(int(tile_rows), 1)
    if rows >= _SUBLANES:
        tile_rows = min(tile_rows, rows)
        tile_rows = max(_SUBLANES, (tile_rows // _SUBLANES) * _SUBLANES)
    else:
        tile_rows = rows  # block dim == full array dim (legal for tiny inputs)
    sub = _SUBLANES if tile_rows % _SUBLANES == 0 else tile_rows

    total_tiles = pl.cdiv(rows, tile_rows)

    if num_splits is None:
        num_splits = _default_num_splits()
    num_splits = max(1, min(int(num_splits), total_tiles))

    inner_steps = pl.cdiv(total_tiles, num_splits)
    has_overrun = num_splits * inner_steps > total_tiles
    valid_rows_last = rows - (total_tiles - 1) * tile_rows

    # ---- Index maps (clamp only when an overrun step exists). ----
    if has_overrun:
        def in_index(o, i):
            return (jnp.minimum(o * inner_steps + i, total_tiles - 1), 0)
    else:
        def in_index(o, i):
            return (o * inner_steps + i, 0)

    def out_index(o, i):
        return (o, 0, 0)

    kernel = functools.partial(
        _bce_ls_kernel,
        smoothing=float(smoothing),
        inner_steps=int(inner_steps),
        total_tiles=int(total_tiles),
        valid_rows_last=int(valid_rows_last),
        sub=int(sub),
        has_overrun=bool(has_overrun),
    )

    # ---- VMEM budget derived from actual double-buffer need (+headroom). ----
    in_block_bytes = tile_rows * lanes * (x_item + t_item)
    out_bytes = num_splits * sub * lanes * 4
    vmem_need = 2 * in_block_bytes + 2 * out_bytes + (2 << 20)
    vmem_limit = int(min(max(vmem_need, 4 << 20), 32 << 20))

    n_proc = rows * lanes
    cost = pl.CostEstimate(
        flops=8 * n_proc,
        transcendentals=2 * n_proc,
        bytes_accessed=n_proc * (x_item + t_item) + out_bytes,
    )

    partials = pl.pallas_call(
        kernel,
        out_shape=jax.ShapeDtypeStruct((num_splits, sub, lanes), jnp.float32),
        grid_spec=pltpu.PrefetchScalarGridSpec(
            num_scalar_prefetch=0,
            grid=(num_splits, inner_steps),
            in_specs=[
                pl.BlockSpec((tile_rows, lanes), in_index),
                pl.BlockSpec((tile_rows, lanes), in_index),
            ],
            out_specs=pl.BlockSpec((None, sub, lanes), out_index),
        ),
        compiler_params=pltpu.CompilerParams(
            dimension_semantics=("parallel", "arbitrary"),
            vmem_limit_bytes=vmem_limit,
        ),
        cost_estimate=cost,
    )(x2, t2)

    total = jnp.sum(partials)
    if pad_elems:
        # Each zero-padded element contributes exactly log(2) (x=0 -> log1p(1)).
        total = total - jnp.float32(pad_elems * _LN2)
    return total / jnp.float32(n_elems)


def _reference(inputs, targets, smoothing=0.1):
    x = inputs.astype(jnp.float32)
    t = targets.astype(jnp.float32) * (1.0 - smoothing) + 0.5 * smoothing
    loss = jnp.maximum(x, 0.0) - x * t + jnp.log1p(jnp.exp(-jnp.abs(x)))
    return jnp.mean(loss)


if __name__ == "__main__":
    key = jax.random.PRNGKey(0)
    ks = jax.random.split(key, 6)

    # Case 1: lane-aligned multi-label classification shape (no pad, no mask).
    B, C = 16, 128
    logits = jax.random.normal(ks[0], (B, C), dtype=jnp.float32) * 2.0
    labels = jax.random.bernoulli(ks[1], p=0.3, shape=(B, C)).astype(jnp.float32)
    loss = jax.block_until_ready(
        bce_with_logits_label_smoothing(logits, labels, smoothing=0.1))
    ref = _reference(logits, labels, smoothing=0.1)
    assert jnp.allclose(loss, ref, rtol=1e-5, atol=1e-5), (loss, ref)

    # Case 2: non-lane-aligned class count + bf16 logits (keeps (R, C) layout,
    # no padding copy at all).
    B2, C2 = 8, 100
    logits2 = (jax.random.normal(ks[2], (B2, C2), dtype=jnp.float32) * 2.0
               ).astype(jnp.bfloat16)
    labels2 = jax.random.bernoulli(ks[3], p=0.3, shape=(B2, C2)).astype(jnp.float32)
    loss2 = jax.block_until_ready(
        bce_with_logits_label_smoothing(logits2, labels2, smoothing=0.1))
    ref2 = _reference(logits2.astype(jnp.float32), labels2, smoothing=0.1)
    assert jnp.allclose(loss2, ref2, rtol=1e-5, atol=1e-5), (loss2, ref2)

    # Case 3: ragged last row-block + forced 2-way split with an overrun step
    # (exercises the gated last-tile mask and the clamped index_map).
    B3, C3 = 300, 128
    logits3 = jax.random.normal(ks[4], (B3, C3), dtype=jnp.float32)
    labels3 = jax.random.bernoulli(ks[5], p=0.5, shape=(B3, C3)).astype(jnp.float32)
    loss3 = jax.block_until_ready(
        bce_with_logits_label_smoothing(logits3, labels3, smoothing=0.1,
                                        tile_rows=64, num_splits=2))
    ref3 = _reference(logits3, labels3, smoothing=0.1)
    assert jnp.allclose(loss3, ref3, rtol=1e-5, atol=1e-5), (loss3, ref3)

    print("KERNEL_OK")
</pallas_src>

<mosaic_0001>
module attributes {stable_mosaic.version = 11 : i64} {
  func.func @_bce_ls_kernel(%arg0: i32, %arg1: i32, %arg2: memref<16x128xf32, #tpu.memory_space<vmem>>, %arg3: memref<16x128xf32, #tpu.memory_space<vmem>>, %arg4: memref<1x8x128xf32, #tpu.memory_space<vmem>>) attributes {dimension_semantics = [#tpu.dimension_semantics<parallel>, #tpu.dimension_semantics<arbitrary>], iteration_bounds = array<i64: 1, 1>, scalar_prefetch = 0 : i64, scratch_operands = 0 : i64, tpu.core_type = #tpu.core_type<tc>, window_params = [{transform_indices = @transform_0, window_bounds = array<i64: 16, 128>}, {transform_indices = @transform_1, window_bounds = array<i64: 16, 128>}, {transform_indices = @transform_2, window_bounds = array<i64: 1, 8, 128>}]} {
    %c0_i32 = arith.constant 0 : i32
    %0 = arith.cmpi eq, %arg1, %c0_i32 : i32
    %1 = arith.extui %0 : i1 to i32
    %c0_i32_0 = arith.constant 0 : i32
    %2 = arith.cmpi ne, %1, %c0_i32_0 : i32
    scf.if %2 {
      %cst_14 = arith.constant 0.000000e+00 : f32
      %27 = vector.broadcast %cst_14 : f32 to vector<8x128xf32>
      %c0_15 = arith.constant 0 : index
      %c0_16 = arith.constant 0 : index
      %c0_17 = arith.constant 0 : index
      %28 = vector.load %arg4[%c0_15, %c0_16, %c0_17] : memref<1x8x128xf32, #tpu.memory_space<vmem>>, vector<1x8x128xf32>
      %29 = vector.shape_cast %28 : vector<1x8x128xf32> to vector<8x128xf32>
      %30 = vector.shape_cast %27 : vector<8x128xf32> to vector<1x8x128xf32>
      tpu.vector_store %arg4[%c0_15, %c0_16, %c0_17], %30 {strides = array<i32>} : memref<1x8x128xf32, #tpu.memory_space<vmem>>, vector<1x8x128xf32>,
    } else {
    }
    %c0 = arith.constant 0 : index
    %c0_1 = arith.constant 0 : index
    %3 = vector.load %arg2[%c0, %c0_1] : memref<16x128xf32, #tpu.memory_space<vmem>>, vector<16x128xf32>
    %c0_2 = arith.constant 0 : index
    %c0_3 = arith.constant 0 : index
    %4 = vector.load %arg3[%c0_2, %c0_3] : memref<16x128xf32, #tpu.memory_space<vmem>>, vector<16x128xf32>
    %cst = arith.constant 0.899999976 : f32
    %5 = vector.broadcast %cst : f32 to vector<16x128xf32>
    %6 = arith.mulf %4, %5 : vector<16x128xf32>
    %cst_4 = arith.constant 5.000000e-02 : f32
    %7 = vector.broadcast %cst_4 : f32 to vector<16x128xf32>
    %8 = arith.addf %6, %7 : vector<16x128xf32>
    %cst_5 = arith.constant 0.000000e+00 : f32
    %9 = vector.broadcast %cst_5 : f32 to vector<16x128xf32>
    %10 = arith.maximumf %3, %9 : vector<16x128xf32>
    %11 = arith.mulf %3, %8 : vector<16x128xf32>
    %12 = arith.subf %10, %11 : vector<16x128xf32>
    %13 = math.absf %3 : vector<16x128xf32>
    %cst_6 = arith.constant 0.000000e+00 : f32
    %14 = vector.broadcast %cst_6 : f32 to vector<16x128xf32>
    %15 = arith.subf %14, %13 : vector<16x128xf32>
    %16 = math.exp %15 : vector<16x128xf32>
    %17 = math.log1p %16 : vector<16x128xf32>
    %18 = arith.addf %12, %17 : vector<16x128xf32>
    %c0_7 = arith.constant 0 : index
    %c0_8 = arith.constant 0 : index
    %c0_9 = arith.constant 0 : index
    %19 = vector.load %arg4[%c0_7, %c0_8, %c0_9] : memref<1x8x128xf32, #tpu.memory_space<vmem>>, vector<1x8x128xf32>
    %20 = vector.shape_cast %19 : vector<1x8x128xf32> to vector<8x128xf32>
    %21 = vector.shape_cast %18 : vector<16x128xf32> to vector<2x8x128xf32>
    %cst_10 = arith.constant dense<0.000000e+00> : vector<8x128xf32>
    %22 = vector.multi_reduction <add>, %21, %cst_10 [0] : vector<2x8x128xf32> to vector<8x128xf32>
    %23 = arith.addf %20, %22 : vector<8x128xf32>
    %c0_11 = arith.constant 0 : index
    %c0_12 = arith.constant 0 : index
    %c0_13 = arith.constant 0 : index
    %24 = vector.load %arg4[%c0_11, %c0_12, %c0_13] : memref<1x8x128xf32, #tpu.memory_space<vmem>>, vector<1x8x128xf32>
    %25 = vector.shape_cast %24 : vector<1x8x128xf32> to vector<8x128xf32>
    %26 = vector.shape_cast %23 : vector<8x128xf32> to vector<1x8x128xf32>
    tpu.vector_store %arg4[%c0_11, %c0_12, %c0_13], %26 {strides = array<i32>} : memref<1x8x128xf32, #tpu.memory_space<vmem>>, vector<1x8x128xf32>,
    return
  }
  func.func @transform_0(%arg0: i32, %arg1: i32) -> (i32, i32) {
    %c1_i32 = arith.constant 1 : i32
    %0 = arith.muli %arg0, %c1_i32 : i32
    %1 = arith.addi %0, %arg1 : i32
    %c0_i32 = arith.constant 0 : i32
    %c0_i32_0 = arith.constant 0 : i32
    return %1, %c0_i32 : i32, i32
  }
  func.func @transform_1(%arg0: i32, %arg1: i32) -> (i32, i32) {
    %c1_i32 = arith.constant 1 : i32
    %0 = arith.muli %arg0, %c1_i32 : i32
    %1 = arith.addi %0, %arg1 : i32
    %c0_i32 = arith.constant 0 : i32
    %c0_i32_0 = arith.constant 0 : i32
    return %1, %c0_i32 : i32, i32
  }
  func.func @transform_2(%arg0: i32, %arg1: i32) -> (i32, i32, i32) {
    %c0_i32 = arith.constant 0 : i32
    %c0_i32_0 = arith.constant 0 : i32
    %c0_i32_1 = arith.constant 0 : i32
    return %arg0, %c0_i32, %c0_i32_0 : i32, i32, i32
  }
}

</mosaic_0001>

<bundles_post_ra>
// kernel: tpu_custom_call.1
= control target key start
LH: loop header
LB: loop body
LE: loop exit
PB: predicated region body
PF: predicated region fallthrough
CT: control target
= control target key end

     0   :  { %7 = vsyncpa [#allocation3], 0  ;;  %s228_s0 = inlined_call_operand.hbm [shape: f32[16,128], index: 0, kind: input, shape index: {}]   ;;  %s229_s1 = inlined_call_operand.hbm [shape: f32[16,128], index: 1, kind: input, shape index: {}]   ;;  %s230_s2 = inlined_call_operand.hbm [shape: f32[1,8,128], index: 2, kind: output, shape index: {}]  }
   0x1   :  { %8 = vsyncpa [#allocation6], 0 }
   0x2   :  { %9 = vsyncpa [#allocation4], 0  ;;  %s199_s9 = smov [#allocation2]  }
   0x3   :  { %s19_s10 = sshll.u32 %s199_s9, 4  ;;  %s20_s10 = int_to_ptr.vmem [resolvable:$true] %s19_s10 }
   0x4   :  { %s141_s11 = scalar_lea.vmem %s20_s10, 256  ;;  %p146_p1 = scmp.lt.s32.totalorder %s20_s10, %s20_s10 }
   0x5   :  { %p142_p0 = scmp.ne.s32.totalorder %s20_s10, %s141_s11  ;;  %p147_p2 = scmp.lt.s32.totalorder %s141_s11, %s141_s11 }
   0x7   :  { %p148_p3 = por %p147_p2, %p146_p1 }
   0x9   :  { %p149_p4 = pnand %p148_p3, %p142_p0 }
   0xb   :  { %152 = shalt.err (!%p149_p4)
}
   0xc   :  { %s200_s12 = smov 128   ;;  %s201_s13 = smov 8  }
   0xd   :  { %25 = dma.hbm_to_vmem [thread:$0]  %s228_s0, 256, %s20_s10, [#allocation3], %s200_s12, %s200_s12, %s201_s13  }
   0xe   :  { %s202_s16 = smov [#allocation5]  }
   0xf   :  { %s35_s17 = sshll.u32 %s202_s16, 4  ;;  %s36_s17 = int_to_ptr.vmem [resolvable:$true] %s35_s17 }
  0x10   :  { %s161_s18 = scalar_lea.vmem %s36_s17, 256  ;;  %p166_p6 = scmp.lt.s32.totalorder %s36_s17, %s36_s17 }
  0x11   :  { %p162_p5 = scmp.ne.s32.totalorder %s36_s17, %s161_s18  ;;  %p167_p7 = scmp.lt.s32.totalorder %s161_s18, %s161_s18 }
  0x13   :  { %p168_p8 = por %p167_p7, %p166_p6 }
  0x15   :  { %p169_p9 = pnand %p168_p8, %p162_p5 }
  0x17   :  { %172 = shalt.err (!%p169_p9)
}
  0x18   :  { %41 = dma.hbm_to_vmem [thread:$0]  %s229_s1, 256, %s36_s17, [#allocation6], %s200_s12, %s200_s12, %s201_s13  }
  0x19   :  { %193 = dma.done.wait [#allocation3], 256  }
  0x1a   :  { %194 = vsyncadd [#allocation3], 4294967040 }
  0x1b   :  { %195 = dma.done.wait [#allocation6], 256  }
  0x1c   :  { %196 = vsyncadd [#allocation6], 4294967040  ;;  %v57_v0 = vld [vmem:[#allocation2] sm:$0xff]  ;;  %v58_v1 = vld [vmem:[#allocation2 + $0x8] sm:$0xff]  ;;  %s203_s0 = smov [#allocation7]  }
  0x1d   :  { %v71_v2 = vand.u32 2147483647, %v57_v0  ;;  %v72_v3 = vand.u32 2147483647, %v58_v1  ;;  %v59_v10 = vld [vmem:[#allocation5] sm:$0xff]  ;;  %v60_v12 = vld [vmem:[#allocation5 + $0x8] sm:$0xff] }
  0x1e   :  { %v61_v14 = vmul.f32 0.9, %v59_v10  ;;  %v62_v15 = vmul.f32 0.9, %v60_v12  ;;  %v65_v21 = vmax.f32 %v57_v0, 0.0  ;;  %v66_v25 = vmax.f32 %v58_v1, 0.0 }
  0x1f   :  { %v73_v4 = vsub.f32 0.0, %v71_v2  ;;  %v74_v5 = vsub.f32 0.0, %v72_v3  ;;  %s109_s1 = sshll.u32 %s203_s0, 4  ;;  %s110_s1 = int_to_ptr.vmem [resolvable:$true] %s109_s1 }
  0x20   :  { %v63_v17 = vadd.f32 0.05, %v61_v14  ;;  %v64_v19 = vadd.f32 0.05, %v62_v15  ;;  %s173_s21 = scalar_lea.vmem %s110_s1, 128  ;;  %p178_p11 = scmp.lt.s32.totalorder %s110_s1, %s110_s1 }
  0x21   :  { %v75_v6 = vmul.f32 1.442695, %v73_v4  ;;  %v77_v7 = vmul.f32 1.442695, %v74_v5  ;;  %p174_p10 = scmp.ne.s32.totalorder %s110_s1, %s173_s21  ;;  %p179_p12 = scmp.lt.s32.totalorder %s173_s21, %s173_s21 }
  0x22   :  { %v67_v22 = vmul.f32 %v63_v17, %v57_v0  ;;  %v68_v26 = vmul.f32 %v64_v19, %v58_v1 }
  0x23   :  { %125 = vpow2.f32 %v75_v6  ;;  %p180_p13 = por %p179_p12, %p178_p11 }
  0x24   :  { %127 = vpow2.f32 %v77_v7  ;;  %v69_v30 = vsub.f32 %v65_v21, %v67_v22  ;;  %v70_v33 = vsub.f32 %v66_v25, %v68_v26 }
  0x25   :  { %p181_p0 = pnand %p180_p13, %p174_p10 }
  0x30   :  { %v126_v8 = vpop.eup %125 }
  0x31   :  { %v128_v9 = vpop.eup %127  ;;  %v79_v11 = vadd.f32 1.0, %v126_v8  ;;  %v82_v16 = vmul.f32 -0.5, %v126_v8  ;;  %v85_v23 = vand.u32 2147483647, %v126_v8 }
  0x32   :  { %v88_v13 = vadd.f32 1.0, %v128_v9  ;;  %v91_v18 = vmul.f32 -0.5, %v128_v9  ;;  %v94_v27 = vand.u32 2147483647, %v128_v9 }
  0x33   :  { %129 = vlog2.f32 %v79_v11  ;;  %v83_v20 = vadd.f32 1.0, %v82_v16  ;;  %vm86_vm0 = vcmp.lt.f32.partialorder %v85_v23, 0.0004427343 }
  0x34   :  { %131 = vlog2.f32 %v88_v13  ;;  %v92_v24 = vadd.f32 1.0, %v91_v18  ;;  %vm95_vm1 = vcmp.lt.f32.partialorder %v94_v27, 0.0004427343 }
  0x35   :  { %v84_v28 = vmul.f32 %v126_v8, %v83_v20 }
  0x36   :  { %v93_v31 = vmul.f32 %v128_v9, %v92_v24 }
  0x40   :  { %v130_v29 = vpop.eup %129 }
  0x41   :  { %v132_v32 = vpop.eup %131  ;;  %v81_v34 = vmul.f32 0.6931472, %v130_v29 }
  0x42   :  { %v90_v35 = vmul.f32 0.6931472, %v132_v32 }
  0x43   :  { %v87_v36 = vsel %vm86_vm0, %v84_v28, %v81_v34 }
  0x44   :  { %v96_v37 = vsel %vm95_vm1, %v93_v31, %v90_v35  ;;  %v97_v38 = vadd.f32 %v87_v36, %v69_v30 }
  0x45   :  { %v98_v39 = vadd.f32 %v96_v37, %v70_v33 }
  0x47   :  { %v100_v40 = vadd.f32 %v98_v39, %v97_v38 }
  0x49   :  { %102 = vst [vmem:[#allocation7] sm:$0xff] %v100_v40 }
  0x4a   :  { %184 = shalt.err (!%p181_p0)
}
  0x4b   :  { %112 = dma.vmem_to_hbm [thread:$0]  %s110_s1, 128, %s230_s2, [#allocation4]  }
  0x4c   :  { %197 = dma.done.wait [#allocation4], 128  }
  0x4d   :  { %198 = vsyncadd [#allocation4], 4294967168 }
  0x4e   :  { %116 = vsyncpa [#allocation3], 1 }
  0x4f   :  { %117 = vsyncpa [#allocation6], 1 }
  0x50   :  { %118 = vsyncpa [#allocation4], 1 }

</bundles_post_ra>
